<compile_context>
chip_gen: v7x
topology: tpu7x:2x2x1
jax: 0.10.0
libtpu: 0.0.40
codegen_flags: <defaults>
</compile_context>

<pallas_src>
import functools

import jax
import jax.numpy as jnp
from jax import lax
from jax.experimental import pallas as pl
from jax.experimental.pallas import tpu as pltpu


def _barlow_twins_kernel(img_ref, txt_ref, out_ref, acc_ref, *,
                         lam: float, inv_n: float, tn: int, resident: bool):
    i = pl.program_id(0)
    j = pl.program_id(1)
    k = pl.program_id(2)
    nk = pl.num_programs(2)

    # LHS tile: either sliced out of the VMEM-resident [N, td] slab, or a
    # streamed (tn, td) block.
    if resident:
        row0 = pl.multiple_of(k * tn, tn)
        x_tile = img_ref[pl.ds(row0, tn), :]
    else:
        x_tile = img_ref[...]
    y_tile = txt_ref[...]

    # Raw X^T.Y partial: contract on axis 0 of both operands (no .T / XLU
    # transpose); native-dtype (bf16) operands, f32 accumulator.
    xty = lax.dot_general(
        x_tile, y_tile,
        dimension_numbers=(((0,), (0,)), ((), ())),
        preferred_element_type=jnp.float32)

    # Overwrite on the first k step (skips a td^2 zero store + read-add).
    @pl.when(k == 0)
    def _():
        acc_ref[...] = xty

    @pl.when(k > 0)
    def _():
        acc_ref[...] += xty

    @pl.when(k == nk - 1)
    def _epilogue():
        ccm = acc_ref[...] * inv_n          # features already z-scored
        ccm2 = ccm * ccm

        # Off-diagonal-style contribution for every tile.
        out_ref[...] = jnp.zeros(out_ref.shape, out_ref.dtype) + lam * jnp.sum(ccm2)

        # Diagonal tiles: correct diag entries to (ccm - 1)^2, reusing ccm2.
        # (ccm-1)^2 - lam*ccm^2 == (1-lam)*ccm^2 - 2*ccm + 1
        @pl.when(i == j)
        def _():
            row = lax.broadcasted_iota(jnp.int32, ccm.shape, 0)
            col = lax.broadcasted_iota(jnp.int32, ccm.shape, 1)
            corr = jnp.where(row == col,
                             (1.0 - lam) * ccm2 - 2.0 * ccm + 1.0,
                             0.0)
            out_ref[...] += jnp.sum(corr)


def _round_up(x: int, m: int) -> int:
    return ((x + m - 1) // m) * m


def barlow_twins_loss(image_features, text_features,
                      lambda_param: float = 0.0051,
                      *, block_d: int = 512, block_n: int = 512,
                      compute_dtype=jnp.bfloat16,
                      resident_image=None):
    """image_features, text_features: [N, D]. Returns the scalar BT loss."""
    assert image_features.shape == text_features.shape
    n, d = image_features.shape
    assert n >= 2, "unbiased (ddof=1) std requires at least 2 samples"

    # ---- tile sizes: always multiples of 128; pad ragged N / D with zeros ----
    td = _round_up(min(block_d, _round_up(d, 128)), 128)
    tn = _round_up(min(block_n, _round_up(n, 128)), 128)
    d_pad = _round_up(d, td)
    n_pad = _round_up(n, tn)
    gi = d_pad // td
    gj = d_pad // td
    gk = n_pad // tn

    # ---- f32 z-score normalization (single fused stats pass), then cast ----
    # torch.std default is unbiased (ddof = 1).
    def znorm(x):
        xf = x.astype(jnp.float32)
        mean = jnp.mean(xf, axis=0, keepdims=True)
        var = (jnp.mean(xf * xf, axis=0, keepdims=True) - mean * mean)
        var = var * (n / (n - 1.0))
        return (xf - mean) * lax.rsqrt(var)

    x = znorm(image_features).astype(compute_dtype)
    y = znorm(text_features).astype(compute_dtype)
    if (n_pad, d_pad) != (n, d):
        pad = ((0, n_pad - n), (0, d_pad - d))
        x = jnp.pad(x, pad)   # zero rows contribute 0; zero cols fixed below
        y = jnp.pad(y, pad)

    # ---- VMEM budget: resident per-i image slab vs streamed tiles ----
    item = jnp.dtype(compute_dtype).itemsize
    try:
        vmem_cap = int(pltpu.get_tpu_info().vmem_capacity_bytes)
    except Exception:  # pragma: no cover - conservative v7x per-core floor
        vmem_cap = 64 * 1024 * 1024
    acc_bytes = td * td * 4
    txt_bytes = 2 * tn * td * item          # double-buffered text tile
    out_bytes = 2 * 8 * 128 * 4
    slab_bytes = 2 * n_pad * td * item      # double-buffered image slab
    if resident_image is None:
        resident_image = (acc_bytes + txt_bytes + slab_bytes + out_bytes
                          <= int(0.55 * vmem_cap))
    img_bytes = slab_bytes if resident_image else 2 * tn * td * item
    vmem_limit = int(min(0.9 * vmem_cap,
                         max(32 * 1024 * 1024,
                             acc_bytes + txt_bytes + img_bytes + out_bytes
                             + 4 * 1024 * 1024)))

    if resident_image:
        img_spec = pl.BlockSpec((n_pad, td), lambda i, j, k: (0, i))
    else:
        img_spec = pl.BlockSpec((tn, td), lambda i, j, k: (k, i))

    kernel = functools.partial(_barlow_twins_kernel,
                               lam=float(lambda_param),
                               inv_n=1.0 / n,
                               tn=tn,
                               resident=bool(resident_image))

    out = pl.pallas_call(
        kernel,
        out_shape=jax.ShapeDtypeStruct((gi, gj, 8, 128), jnp.float32),
        grid_spec=pltpu.PrefetchScalarGridSpec(
            num_scalar_prefetch=0,
            grid=(gi, gj, gk),
            in_specs=[
                img_spec,                                        # image feats
                pl.BlockSpec((tn, td), lambda i, j, k: (k, j)),  # text feats
            ],
            out_specs=pl.BlockSpec((1, 1, 8, 128),
                                   lambda i, j, k: (i, j, 0, 0)),
            scratch_shapes=[pltpu.VMEM((td, td), jnp.float32)],
        ),
        compiler_params=pltpu.CompilerParams(
            dimension_semantics=("parallel", "parallel", "arbitrary"),
            vmem_limit_bytes=vmem_limit,
        ),
    )(x, y)

    # Every element of out[i, j] holds the same per-tile partial; sum one lane
    # per tile.  Each padded diagonal entry contributed exactly (0-1)^2 = 1.
    return jnp.sum(out[:, :, 0, 0]) - float(d_pad - d)


def _reference_loss(image_features, text_features, lambda_param=0.0051):
    """Pure-JAX reference mirroring the PyTorch module semantics."""
    def znorm(x):
        mean = jnp.mean(x, axis=0, keepdims=True)
        std = jnp.std(x, axis=0, keepdims=True, ddof=1)
        return (x - mean) / std

    zi = znorm(image_features.astype(jnp.float32))
    zt = znorm(text_features.astype(jnp.float32))
    n, d = image_features.shape
    ccm = zi.T @ zt / n
    c_diff = (ccm - jnp.eye(d, dtype=ccm.dtype)) ** 2
    off = ~jnp.eye(d, dtype=bool)
    c_diff = jnp.where(off, c_diff * lambda_param, c_diff)
    return jnp.sum(c_diff)


if __name__ == "__main__":
    key = jax.random.PRNGKey(0)
    k1, k2, k3, k4 = jax.random.split(key, 4)

    # Case 1: 2x2 D tiles + 2-step N reduction, bf16 MXU path, resident slab.
    N, D = 256, 256
    img = jax.random.normal(k1, (N, D), dtype=jnp.float32)
    txt = jax.random.normal(k2, (N, D), dtype=jnp.float32)
    ref = _reference_loss(img, txt, 0.0051)

    got = jax.block_until_ready(
        barlow_twins_loss(img, txt, 0.0051, block_d=128, block_n=128))
    assert jnp.allclose(got, ref, rtol=2e-3, atol=1e-2), (got, ref)

    # Case 2: default (single-block) tiles, f32 operands, tight tolerance.
    got32 = jax.block_until_ready(
        barlow_twins_loss(img, txt, 0.0051, compute_dtype=jnp.float32))
    assert jnp.allclose(got32, ref, rtol=2e-4, atol=1e-3), (got32, ref)

    # Case 3: streamed (non-resident) image path.
    got_s = jax.block_until_ready(
        barlow_twins_loss(img, txt, 0.0051, block_d=128, block_n=128,
                          resident_image=False))
    assert jnp.allclose(got_s, ref, rtol=2e-3, atol=1e-2), (got_s, ref)

    # Case 4: ragged shapes exercising N/D zero-padding + diag correction.
    N2, D2 = 100, 200
    img2 = jax.random.normal(k3, (N2, D2), dtype=jnp.float32)
    txt2 = jax.random.normal(k4, (N2, D2), dtype=jnp.float32)
    ref2 = _reference_loss(img2, txt2, 0.0051)
    got2 = jax.block_until_ready(barlow_twins_loss(img2, txt2, 0.0051))
    assert jnp.allclose(got2, ref2, rtol=2e-3, atol=1e-2), (got2, ref2)

    print("KERNEL_OK")
</pallas_src>

<mosaic_0001>
module attributes {stable_mosaic.version = 11 : i64} {
  func.func @_barlow_twins_kernel(%arg0: i32, %arg1: i32, %arg2: i32, %arg3: memref<256x128xbf16, #tpu.memory_space<vmem>>, %arg4: memref<128x128xbf16, #tpu.memory_space<vmem>>, %arg5: memref<1x1x8x128xf32, #tpu.memory_space<vmem>>, %arg6: memref<128x128xf32, #tpu.memory_space<vmem>>) attributes {dimension_semantics = [#tpu.dimension_semantics<parallel>, #tpu.dimension_semantics<parallel>, #tpu.dimension_semantics<arbitrary>], iteration_bounds = array<i64: 2, 2, 2>, scalar_prefetch = 0 : i64, scratch_operands = 1 : i64, tpu.core_type = #tpu.core_type<tc>, window_params = [{transform_indices = @transform_0, window_bounds = array<i64: 256, 128>}, {transform_indices = @transform_1, window_bounds = array<i64: 128, 128>}, {transform_indices = @transform_2, window_bounds = array<i64: 1, 1, 8, 128>}]} {
    %c128_i32 = arith.constant 128 : i32
    %0 = arith.muli %arg2, %c128_i32 : i32
    %1 = tpu.assume_multiple %0, 128 : i32
    %2 = arith.index_cast %1 : i32 to index
    %c0 = arith.constant 0 : index
    %3 = vector.load %arg3[%2, %c0] : memref<256x128xbf16, #tpu.memory_space<vmem>>, vector<128x128xbf16>
    %c0_0 = arith.constant 0 : index
    %c0_1 = arith.constant 0 : index
    %4 = vector.load %arg4[%c0_0, %c0_1] : memref<128x128xbf16, #tpu.memory_space<vmem>>, vector<128x128xbf16>
    %cst = arith.constant dense<0.000000e+00> : vector<128x128xf32>
    %5 = tpu.matmul %3, %4, %cst {dimension_numbers = #tpu.dot_dimension_numbers<[0], [0], [1], [1], [0, 1, 1, 1], [], []>} : vector<128x128xbf16>, vector<128x128xbf16>, vector<128x128xf32> -> vector<128x128xf32>
    %c0_i32 = arith.constant 0 : i32
    %6 = arith.cmpi eq, %arg2, %c0_i32 : i32
    %7 = arith.extui %6 : i1 to i32
    %c0_i32_2 = arith.constant 0 : i32
    %8 = arith.cmpi ne, %7, %c0_i32_2 : i32
    scf.if %8 {
      %c0_6 = arith.constant 0 : index
      %c0_7 = arith.constant 0 : index
      %15 = vector.load %arg6[%c0_6, %c0_7] : memref<128x128xf32, #tpu.memory_space<vmem>>, vector<128x128xf32>
      tpu.vector_store %arg6[%c0_6, %c0_7], %5 {strides = array<i32>} : memref<128x128xf32, #tpu.memory_space<vmem>>, vector<128x128xf32>,
    } else {
    }
    %c0_i32_3 = arith.constant 0 : i32
    %9 = arith.cmpi sgt, %arg2, %c0_i32_3 : i32
    %10 = arith.extui %9 : i1 to i32
    %c0_i32_4 = arith.constant 0 : i32
    %11 = arith.cmpi ne, %10, %c0_i32_4 : i32
    scf.if %11 {
      %c0_6 = arith.constant 0 : index
      %c0_7 = arith.constant 0 : index
      %15 = vector.load %arg6[%c0_6, %c0_7] : memref<128x128xf32, #tpu.memory_space<vmem>>, vector<128x128xf32>
      %16 = arith.addf %15, %5 : vector<128x128xf32>
      %c0_8 = arith.constant 0 : index
      %c0_9 = arith.constant 0 : index
      %17 = vector.load %arg6[%c0_8, %c0_9] : memref<128x128xf32, #tpu.memory_space<vmem>>, vector<128x128xf32>
      tpu.vector_store %arg6[%c0_8, %c0_9], %16 {strides = array<i32>} : memref<128x128xf32, #tpu.memory_space<vmem>>, vector<128x128xf32>,
    } else {
    }
    %c1_i32 = arith.constant 1 : i32
    %12 = arith.cmpi eq, %arg2, %c1_i32 : i32
    %13 = arith.extui %12 : i1 to i32
    %c0_i32_5 = arith.constant 0 : i32
    %14 = arith.cmpi ne, %13, %c0_i32_5 : i32
    scf.if %14 {
      %c0_6 = arith.constant 0 : index
      %c0_7 = arith.constant 0 : index
      %15 = vector.load %arg6[%c0_6, %c0_7] : memref<128x128xf32, #tpu.memory_space<vmem>>, vector<128x128xf32>
      %cst_8 = arith.constant 3.906250e-03 : f32
      %16 = vector.broadcast %cst_8 : f32 to vector<128x128xf32>
      %17 = arith.mulf %15, %16 : vector<128x128xf32>
      %18 = arith.mulf %17, %17 : vector<128x128xf32>
      %cst_9 = arith.constant 0.000000e+00 : f32
      %19 = vector.broadcast %cst_9 : f32 to vector<1x1x8x128xf32>
      %20 = vector.shape_cast %18 : vector<128x128xf32> to vector<1x128x128xf32>
      %cst_10 = arith.constant dense<0.000000e+00> : vector<1xf32>
      %21 = vector.multi_reduction <add>, %20, %cst_10 [1, 2] : vector<1x128x128xf32> to vector<1xf32>
      %22 = vector.shape_cast %21 : vector<1xf32> to vector<1x1x1xf32>
      %23 = vector.extract %22[0, 0, 0] : f32 from vector<1x1x1xf32>
      %cst_11 = arith.constant 5.100000e-03 : f32
      %24 = arith.mulf %cst_11, %23 : f32
      %25 = vector.broadcast %24 : f32 to vector<1x1x8x128xf32>
      %26 = arith.addf %19, %25 : vector<1x1x8x128xf32>
      %c0_12 = arith.constant 0 : index
      %c0_13 = arith.constant 0 : index
      %c0_14 = arith.constant 0 : index
      %c0_15 = arith.constant 0 : index
      %27 = vector.load %arg5[%c0_12, %c0_13, %c0_14, %c0_15] : memref<1x1x8x128xf32, #tpu.memory_space<vmem>>, vector<1x1x8x128xf32>
      tpu.vector_store %arg5[%c0_12, %c0_13, %c0_14, %c0_15], %26 {strides = array<i32>} : memref<1x1x8x128xf32, #tpu.memory_space<vmem>>, vector<1x1x8x128xf32>,
      %28 = arith.cmpi eq, %arg0, %arg1 : i32
      %29 = arith.extui %28 : i1 to i32
      %c0_i32_16 = arith.constant 0 : i32
      %30 = arith.cmpi ne, %29, %c0_i32_16 : i32
      scf.if %30 {
        %31 = tpu.iota {dimensions = array<i32: 0>} : vector<128x128xi32>
        %32 = tpu.iota {dimensions = array<i32: 1>} : vector<128x128xi32>
        %33 = arith.cmpi eq, %31, %32 : vector<128x128xi32>
        %cst_17 = arith.constant 0.994899988 : f32
        %34 = vector.broadcast %cst_17 : f32 to vector<128x128xf32>
        %35 = arith.mulf %34, %18 : vector<128x128xf32>
        %cst_18 = arith.constant 2.000000e+00 : f32
        %36 = vector.broadcast %cst_18 : f32 to vector<128x128xf32>
        %37 = arith.mulf %36, %17 : vector<128x128xf32>
        %38 = arith.subf %35, %37 : vector<128x128xf32>
        %cst_19 = arith.constant 1.000000e+00 : f32
        %39 = vector.broadcast %cst_19 : f32 to vector<128x128xf32>
        %40 = arith.addf %38, %39 : vector<128x128xf32>
        %cst_20 = arith.constant 0.000000e+00 : f32
        %41 = vector.broadcast %cst_20 : f32 to vector<128x128xf32>
        %42 = arith.select %33, %40, %41 : vector<128x128xi1>, vector<128x128xf32>
        %c0_21 = arith.constant 0 : index
        %c0_22 = arith.constant 0 : index
        %c0_23 = arith.constant 0 : index
        %c0_24 = arith.constant 0 : index
        %43 = vector.load %arg5[%c0_21, %c0_22, %c0_23, %c0_24] : memref<1x1x8x128xf32, #tpu.memory_space<vmem>>, vector<1x1x8x128xf32>
        %44 = vector.shape_cast %42 : vector<128x128xf32> to vector<1x128x128xf32>
        %cst_25 = arith.constant dense<0.000000e+00> : vector<1xf32>
        %45 = vector.multi_reduction <add>, %44, %cst_25 [1, 2] : vector<1x128x128xf32> to vector<1xf32>
        %46 = vector.shape_cast %45 : vector<1xf32> to vector<1x1x1xf32>
        %47 = vector.extract %46[0, 0, 0] : f32 from vector<1x1x1xf32>
        %48 = vector.broadcast %47 : f32 to vector<1x1x8x128xf32>
        %49 = arith.addf %43, %48 : vector<1x1x8x128xf32>
        %c0_26 = arith.constant 0 : index
        %c0_27 = arith.constant 0 : index
        %c0_28 = arith.constant 0 : index
        %c0_29 = arith.constant 0 : index
        %50 = vector.load %arg5[%c0_26, %c0_27, %c0_28, %c0_29] : memref<1x1x8x128xf32, #tpu.memory_space<vmem>>, vector<1x1x8x128xf32>
        tpu.vector_store %arg5[%c0_26, %c0_27, %c0_28, %c0_29], %49 {strides = array<i32>} : memref<1x1x8x128xf32, #tpu.memory_space<vmem>>, vector<1x1x8x128xf32>,
      } else {
      }
    } else {
    }
    return
  }
  func.func @transform_0(%arg0: i32, %arg1: i32, %arg2: i32) -> (i32, i32) {
    %c0_i32 = arith.constant 0 : i32
    %c0_i32_0 = arith.constant 0 : i32
    return %c0_i32, %arg0 : i32, i32
  }
  func.func @transform_1(%arg0: i32, %arg1: i32, %arg2: i32) -> (i32, i32) {
    %c0_i32 = arith.constant 0 : i32
    return %arg2, %arg1 : i32, i32
  }
  func.func @transform_2(%arg0: i32, %arg1: i32, %arg2: i32) -> (i32, i32, i32, i32) {
    %c0_i32 = arith.constant 0 : i32
    %c0_i32_0 = arith.constant 0 : i32
    %c0_i32_1 = arith.constant 0 : i32
    return %arg0, %arg1, %c0_i32, %c0_i32_0 : i32, i32, i32, i32
  }
}

</mosaic_0001>

<bundles_post_ra>
// kernel: tpu_custom_call.1
= control target key start
LH: loop header
LB: loop body
LE: loop exit
PB: predicated region body
PF: predicated region fallthrough
CT: control target
= control target key end

     0   :  { %s2018_s0 = inlined_call_operand.hbm [shape: bf16[256,256], index: 0, kind: input, shape index: {}]   ;;  %s2019_s1 = inlined_call_operand.hbm [shape: bf16[256,256], index: 1, kind: input, shape index: {}]   ;;  %s2020_s2 = inlined_call_operand.hbm [shape: f32[2,2,8,128], index: 2, kind: output, shape index: {}]  }
   0x1   :  { %2037 = sst [smem:[#allocation21_spill]] %s2018_s0 }
   0x2   :  { %2038 = sst [smem:[#allocation22_spill]] %s2020_s2 }
   0x3   :  { %7 = vsyncpa [#allocation4], 0 }
   0x4   :  { %9 = vsyncpa [#allocation4 + $0x1], 0 }
   0x5   :  { %10 = vsyncpa [#allocation7], 0 }
   0x6   :  { %12 = vsyncpa [#allocation7 + $0x1], 0 }
   0x7   :  { %13 = vsyncpa [#allocation5], 0 }
   0x8   :  { %15 = vsyncpa [#allocation5 + $0x1], 0  ;;  %s1430_s9 = smov 0   ;;  %s1432_s10 = smov 0  }
   0x9   :  { %s1434_s11 = smov 0   ;;  %s1436_s12 = smov 0  }
   0xa   :  { %s1438_s13 = smov 0   ;;  %s1440_s14 = smov 0  }
   0xb   :  { %s1442_s15 = smov 0   ;;  %s1444_s16 = smov 0  }
   0xc   :  { %s1446_s17 = smov 0   ;;  %s1448_s18 = smov 0  }
   0xd   :  { %s1450_s19 = smov 0   ;;  %s1452_s20 = smov 0  }
   0xe   :  { %s1454_s21 = smov 0   ;;  %s1456_s22 = smov 0  }
   0xf   :  { %s1458_s23 = smov 0   ;;  %s1460_s24 = smov 0  }
  0x10 LB: > { %2039 = sst [smem:[#allocation12_spill]] %s1347_s9  ;;  %s905_s25 = sadd.s32 4294967295, %s1407_s24   ;;  %s1407_s24 = sphi %s1460_s24, %s21_s24   ;;  %s1403_s23 = sphi %s1458_s23, %s2084_s23   ;;  %s1399_s22 = sphi %s1456_s22, %s2098_s22   ;;  %s1395_s21 = sphi %s1454_s21, %s2097_s21   ;;  %s1391_s20 = sphi %s1452_s20, %s2081_s20   ;;  %s1387_s19 = sphi %s1450_s19, %s2096_s19   ;;  %s1383_s18 = sphi %s1448_s18, %s2095_s18   ;;  %s1379_s17 = sphi %s1446_s17, %s2094_s17   ;;  %s1375_s16 = sphi %s1444_s16, %s2093_s16   ;;  %s1371_s15 = sphi %s1442_s15, %s2092_s15   ;;  %s1367_s14 = sphi %s1440_s14, %s2091_s14   ;;  %s1363_s13 = sphi %s1438_s13, %s2090_s13   ;;  %s1359_s12 = sphi %s1436_s12, %s2089_s12   ;;  %s1355_s11 = sphi %s1434_s11, %s2088_s11   ;;  %s1351_s10 = sphi %s1432_s10, %s2087_s10   ;;  %s1347_s9 = sphi %s1430_s9, %s2085_s9  }
  0x11   : > { %2040 = sst [smem:[#allocation13_spill]] %s1387_s19  ;;  %p54_p0 = scmp.ne.s32.totalorder %s1379_s17, %s1375_s16 }
  0x12   : > { %2041 = sst [smem:[#allocation14_spill]] %s1391_s20  ;;  %p2023_p1 = scmp.eq.s32.totalorder %s1407_s24, 0 }
  0x13   : > { %2042 = sst [smem:[#allocation15_spill]] %s1403_s23  ;;  %p60_p2 = scmp.ne.s32.totalorder %s1375_s16, %s1371_s15 }
  0x14   : > { %p1515_p3 = scmp.eq.s32.totalorder %s905_s25, 0  ;;  %p1519_p4 = scmp.eq.s32.totalorder %s905_s25, 7 }
  0x15   : > { %p56_p5 = por %p2023_p1, %p54_p0  ;;  %p2022_p7 = scmp.lt.s32.totalorder %s1407_s24, 8 }
  0x16   : > { %s2044_s29 = scalar_select %p1519_p4, 1, 0 }
  0x17   : > { %p1527_p6 = por %p1515_p3, %p60_p2  ;;  %s140_s3 = sand.u32 1, %s1379_s17  }
  0x18   : > { %s910_s4 = sshll.u32 %s1403_s23, 6  ;;  %s909_s5 = sshll.u32 %s140_s3, 7 }
  0x19   : > { %s2045_s30 = scalar_select %p1527_p6, 1, 0 }
  0x1a   : > { %s2046_s0 = sld [smem:[#allocation21_spill]]  ;;  %s144_s15 = scalar_lea.vmem [#allocation3], %s909_s5 }
  0x1b   : > { %s150_s25 = sshll.u32 %s144_s15, 4  ;;  %p1541_p8 = pnand %p2022_p7, %p56_p5  ;;  %s1545_s25 = int_to_ptr.vmem [resolvable:$true] %s150_s25 }
  0x1c   : > { %s1548_s26 = scalar_lea.sflag [#allocation4], %s140_s3 }
  0x1d   : > { %p1183_p11 = pneg %p1541_p8 }
  0x20   : > { %s1537_s8 = scalar_lea.hbm %s2046_s0, %s910_s4  ;;  %s1186_s7 = scalar_lea.hbm %s2046_s0, 4096 }
  0x21   : > { %s1181_s4 = scalar_lea.hbm %s1537_s8, 2048  ;;  %p1187_p0 = scmp.lt.u32.totalorder %s1537_s8, %s2046_s0 }
  0x22   : > { %p1182_p10 = scmp.ne.s32.totalorder %s1537_s8, %s1181_s4  ;;  %p1188_p2 = scmp.lt.u32.totalorder %s1186_s7, %s1181_s4 }
  0x23   : > { %p1190_p7 = scmp.lt.u32.totalorder %s1181_s4, %s1537_s8 }
  0x24   : > { %p1184_p12 = pnand %p1183_p11, %p1182_p10  ;;  %p1189_p5 = por %p1188_p2, %p1187_p0 }
  0x26   : > { %p1185_p13 = pneg %p1184_p12  ;;  %p1191_p1 = por %p1190_p7, %p1189_p5 }
  0x28   : > { %p1192_p9 = pnand %p1191_p1, %p1185_p13 }
  0x2a   : > { %1195 = shalt.err (!%p1192_p9)
}
  0x2b   : > { %s1196_s3 = scalar_lea.vmem %s1545_s25, 2048  ;;  %s1409_s5 = smov [#allocation3]  }
  0x2c   : > { %p1197_p10 = scmp.ne.s32.totalorder %s1545_s25, %s1196_s3  ;;  %s1201_s6 = sshll.u32 %s1409_s5, 4  ;;  %s1202_s6 = int_to_ptr.vmem [resolvable:$false] %s1201_s6 }
  0x2d   : > { %s1203_s2 = scalar_lea.vmem %s1202_s6, 4096  ;;  %p1204_p4 = scmp.lt.s32.totalorder %s1545_s25, %s1202_s6 }
  0x2e   : > { %p1199_p12 = pnand %p1197_p10, %p1183_p11  ;;  %p1205_p0 = scmp.lt.s32.totalorder %s1203_s2, %s1196_s3 }
  0x30   : > { %p1200_p6 = pneg %p1199_p12  ;;  %p1206_p2 = por %p1205_p0, %p1204_p4 }
  0x32   : > { %p1207_p7 = pnand %p1206_p2, %p1200_p6 }
  0x34   : > { %1210 = shalt.err (!%p1207_p7)
}
  0x35   : > { %s2025_s4 = smov 128   ;;  %s2026_s7 = smov 64  }
  0x36   : > { %s2027_s15 = smov 4   ;;  %p181_p1 = scmp.lt.s32.totalorder %s1407_s24, 9 }
  0x37   : > { %1024 = dma.hbm_to_vmem [thread:$0]  (!%p1541_p8), %s1537_s8, 2048, %s1545_s25, %s1548_s26, %s2025_s4, %s2026_s7, %s2027_s15  }
  0x38   : > { %p2048_p4 = scmp.ge.s32.totalorder %s1407_s24, 1  ;;  %s906_s5 = sadd.s32 4294967294, %s1407_s24  }
  0x39   : > { %s33_s6 = sadd.s32 1, %s1395_s21  ;;  %s36_s27 = sadd.s32 1, %s1399_s22 }
  0x3a   : > { %p1582_p6 = pnand %p2048_p4, %p181_p1  ;;  %p34_p9 = scmp.ge.s32.totalorder %s33_s6, 2 }
  0x3b   : > { %s75_s2 = sadd.s32 1, %s1367_s14  ;;  %p82_p11 = scmp.ne.s32.totalorder %s1367_s14, %s1363_s13 }
  0x3c   : > { %s2100_s6 = smov (%p34_p9, %s33_s6), 0  ;;  %s2102_s27 = smov (!%p34_p9, %s36_s27), %s1399_s22 }
  0x3d   : > { %2050 = sst [smem:[#allocation16_spill]] %s2100_s6  ;;  %s70_s26 = ssub.s32 %s1395_s21, %s2100_s6 }
  0x3e   : > { %p2051_p8 = scmp.eq.s32.totalorder %s1407_s24, 0  ;;  %p38_p5 = scmp.ge.s32.totalorder %s2102_s27, 2 }
  0x3f   : > { %p88_p10 = scmp.ne.s32.totalorder %s1363_s13, %s1359_s12  ;;  %s103_s25 = sadd.s32 1, %s1355_s11 }
  0x40   : > { %p1599_p13 = por %p82_p11, %p2051_p8  ;;  %p113_p12 = scmp.ne.s32.totalorder %s1355_s11, %s1351_s10 }
  0x41   : > { %s2104_s27 = smov (%p38_p5, %s2102_s27), 0  ;;  %s2054_s4 = sadd.s32 1, %s1403_s23 }
  0x42   : > { %2053 = sst [smem:[#allocation17_spill]] %s2104_s27  ;;  %s2106_s4 = smov (!%p38_p5, %s2054_s4), %s1403_s23 }
  0x43   : > { %s71_s7 = ssub.s32 %s1399_s22, %s2104_s27  ;;  %p1617_p0 = por %p88_p10, %p1515_p3 }
  0x44   : > { %p42_p2 = scmp.ge.s32.totalorder %s2106_s4, 2  ;;  %s72_s0 = sor.u32 %s71_s7, %s70_s26 }
  0x45   : > { %s2055_s15 = scalar_select %p1617_p0, 1, 0 }
  0x46   : > { %p73_p7 = scmp.eq.s32.totalorder %s72_s0, 0  ;;  %p2056_p1 = scmp.ne.s32.totalorder %s2044_s29, 0 }
  0x47   : > { %s2108_s4 = smov (%p42_p2, %s2106_s4), 0  ;;  %p119_p3 = scmp.ne.s32.totalorder %s1351_s10, %s1347_s9 }
  0x48   : > { %p1623_p4 = por %p2056_p1, %p113_p12  ;;  %2059 = sst [smem:[#allocation19_spill]] %s2108_s4 }
  0x49   : > { %s1630_s27 = scalar_select %p73_p7, %s1367_s14, %s75_s2  }
  0x4a   : > { %s2057_s12 = scalar_select %p1623_p4, 1, 0 }
  0x4b   : > { %2060 = sst [smem:[#allocation20_spill]] %s1630_s27  ;;  %s44_s28 = ssub.s32 %s1403_s23, %s2108_s4 }
  0x4c   : > { %2058 = sst [smem:[#allocation18_spill]] %s2057_s12  ;;  %p45_p9 = scmp.eq.s32.totalorder %s44_s28, 0 }
  0x4d   : > { %s100_s6 = sor.u32 %s71_s7, %s44_s28  ;;  %p120_p8 = scmp.eq.s32.totalorder %s906_s5, 7 }
  0x4e   : > { %p101_p11 = scmp.eq.s32.totalorder %s100_s6, 0  ;;  %s2061_s0 = sadd.s32 1, %s1379_s17 }
  0x4f   : > { %s1639_s29 = scalar_select %p45_p9, %s1379_s17, %s2061_s0  }
  0x50   : > { %s1642_s26 = scalar_select %p101_p11, %s1355_s11, %s103_s25  }
  0x51   : > { %p1644_p5 = por %p120_p8, %p119_p3  ;;  %s160_s20 = sand.u32 1, %s1367_s14  }
  0x52   : > { %s911_s2 = sshll.u32 %s160_s20, 6  ;;  %s946_s27 = sshll.u32 %s1395_s21, 5 }
  0x53   : > { %s2062_s12 = scalar_select %p1644_p5, 1, 0 }
  0x54   : > { %s170_s4 = sadd.s32 %s1399_s22, %s946_s27  ;;  %s164_s23 = scalar_lea.vmem [#allocation6], %s911_s2 }
  0x55   : > { %s173_s9 = sshll.u32 %s164_s23, 4  ;;  %s914_s19 = sshll.u32 %s170_s4, 6  ;;  %s1651_s9 = int_to_ptr.vmem [resolvable:$true] %s173_s9 }
  0x56   : > { %s1656_s6 = scalar_lea.hbm %s2019_s1, %s914_s19  ;;  %p2063_p10 = scmp.lt.s32.totalorder %s1407_s24, 8 }
  0x57   : > { %s1666_s23 = scalar_lea.sflag [#allocation7], %s160_s20  ;;  %s1211_s4 = scalar_lea.hbm %s1656_s6, 1024 }
  0x58   : > { %p1662_p12 = pnand %p2063_p10, %p1599_p13  ;;  %p1212_p2 = scmp.ne.s32.totalorder %s1656_s6, %s1211_s4 }
  0x59   : > { %s1216_s8 = scalar_lea.hbm %s2019_s1, 4096  ;;  %p1217_p13 = scmp.lt.u32.totalorder %s1656_s6, %s2019_s1 }
  0x5a   : > { %p1213_p7 = pneg %p1662_p12  ;;  %p1218_p9 = scmp.lt.u32.totalorder %s1216_s8, %s1211_s4 }
  0x5b   : > { %p1220_p8 = scmp.lt.u32.totalorder %s1211_s4, %s1656_s6 }
  0x5c   : > { %p1214_p1 = pnand %p1213_p7, %p1212_p2  ;;  %p1219_p11 = por %p1218_p9, %p1217_p13 }
  0x5e   : > { %p1215_p3 = pneg %p1214_p1  ;;  %p1221_p10 = por %p1220_p8, %p1219_p11 }
  0x60   : > { %p1222_p5 = pnand %p1221_p10, %p1215_p3 }
  0x62   : > { %1225 = shalt.err (!%p1222_p5)
}
  0x63   : > { %s1226_s20 = scalar_lea.vmem %s1651_s9, 1024  ;;  %s1413_s2 = smov [#allocation6]  }
  0x64   : > { %p1227_p2 = scmp.ne.s32.totalorder %s1651_s9, %s1226_s20  ;;  %s1231_s7 = sshll.u32 %s1413_s2, 4  ;;  %s1232_s7 = int_to_ptr.vmem [resolvable:$false] %s1231_s7 }
  0x65   : > { %s1233_s5 = scalar_lea.vmem %s1232_s7, 2048  ;;  %p1234_p0 = scmp.lt.s32.totalorder %s1651_s9, %s1232_s7 }
  0x66   : > { %p1229_p1 = pnand %p1227_p2, %p1213_p7  ;;  %p1235_p13 = scmp.lt.s32.totalorder %s1233_s5, %s1226_s20 }
  0x68   : > { %p1230_p4 = pneg %p1229_p1  ;;  %p1236_p9 = por %p1235_p13, %p1234_p0 }
  0x6a   : > { %p1237_p11 = pnand %p1236_p9, %p1230_p4 }
  0x6c   : > { %1240 = shalt.err (!%p1237_p11)
}
  0x6d   : > { %s2065_s4 = smov 4   ;;  %s2066_s19 = smov 64  }
  0x6e   : > { %s2067_s27 = smov 128   ;;  %185 = sbr.rel (%p1582_p6) target bundleno = 993 (0x3e1), region = 28 }
  0x6f   : > { %1027 = dma.hbm_to_vmem [thread:$0]  (!%p1662_p12), %s1656_s6, 1024, %s1651_s9, %s1666_s23, %s2067_s27, %s2066_s19, %s2065_s4  }
  0x70   : > { %s187_s8 = sand.u32 (!%p1582_p6), 1, %s1375_s16   ;;  %p2068_p0 = scmp.ne.s32.totalorder (!%p1582_p6), %s2045_s30, 0 }
  0x71   : > { %s916_s28 = sshll.u32 (!%p1582_p6), %s187_s8, 7  ;;  %s188_s0 = scalar_lea.sflag (!%p1582_p6), [#allocation4], %s187_s8 }
  0x72   : > { %s191_s20 = scalar_lea.vmem (!%p1582_p6), [#allocation3], %s916_s28 }
  0x75   : > { %1334 = dma.done.wait (%p2068_p0), %s188_s0, 2048  }
  0x76   : > { %1336 = vsyncadd (%p2068_p0), %s188_s0, 4294965248  ;;  %s196_s25 = sand.u32 1, %s1363_s13   ;;  %p2069_p4 = scmp.ne.s32.totalorder %s2055_s15, 0 }
  0x77   : > { %s917_s2 = sshll.u32 %s196_s25, 6  ;;  %s197_s7 = scalar_lea.sflag [#allocation7], %s196_s25 }
  0x78   : > { %s1705_s9 = scalar_lea.vmem [#allocation6], %s917_s2 }
  0x79   : > { %1338 = dma.done.wait (%p2069_p4), %s197_s7, 1024  }
  0x7a   : > { %1340 = vsyncadd (%p2069_p4), %s197_s7, 4294966272  ;;  %s223_s3 = sand.u32 1, %s1351_s10   ;;  %s919_s30 = sshll.u32 %s1383_s18, 7  ;;  %v1173_v3 = vld [vmem:[%s1705_s9] sm:$0xff]   ;;  %v1174_v4 = vld [vmem:[%s1705_s9 + $0x8] sm:$0xff]  }
  0x7b   : > { %s1715_s6 = sshll.u32 %s223_s3, 3  ;;  %s229_s23 = sshra.s32 %s919_s30, 3  ;;  %963 = vmatprep.subr.bf16.mxu0 %v1173_v3  ;;  %995 = vmatprep.subr.bf16.mxu1 %v1173_v3  ;;  %v1175_v6 = vld [vmem:[%s1705_s9 + $0x10] sm:$0xff]   ;;  %v1176_v8 = vld [vmem:[%s1705_s9 + $0x18] sm:$0xff]   ;;  %v1177_v10 = vld [vmem:[%s1705_s9 + $0x20] sm:$0xff]  }
  0x7c   : > { %s920_s5 = sshll.u32 %s229_s23, 2  ;;  %964 = vmatpush3.bf16.msra.mxu0 %v1173_v3  ;;  %1003 = vmatpush3.bf16.msra.mxu1 %v1173_v3  ;;  %v1178_v12 = vld [vmem:[%s1705_s9 + $0x28] sm:$0xff]   ;;  %v1179_v14 = vld [vmem:[%s1705_s9 + $0x30] sm:$0xff]   ;;  %v1180_v15 = vld [vmem:[%s1705_s9 + $0x38] sm:$0xff]   ;;  %s1740_s15 = scalar_lea.vmem [#allocation8], %s1715_s6 }
  0x7d   : > { %s1717_s4 = scalar_lea.vmem %s191_s20, %s920_s5 [#allocation3]  ;;  %965 = vmatprep.subr.bf16.mxu0 %v1174_v4  ;;  %996 = vmatprep.subr.bf16.mxu1 %v1174_v4  ;;  %p937_p6 = scmp.ne.s32.totalorder %s1383_s18, 0 }
  0x7e   : > { %v1165_v0 = vld [vmem:[%s1717_s4] sm:$0xff]   ;;  %v1166_v1 = vld [vmem:[%s1717_s4 + $0x8] sm:$0xff]   ;;  %v1167_v2 = vld [vmem:[%s1717_s4 + $0x10] sm:$0xff]  }
  0x7f   : > { %313 = vxpose.xlu0.c.b16.start [1/8] %v1165_v0, 128  ;;  %v1168_v5 = vld [vmem:[%s1717_s4 + $0x18] sm:$0xff]   ;;  %v1169_v7 = vld [vmem:[%s1717_s4 + $0x20] sm:$0xff]   ;;  %v1170_v9 = vld [vmem:[%s1717_s4 + $0x28] sm:$0xff]  }
  0x80   : > { %966 = vmatpush3.bf16.msra.mxu0 %v1174_v4  ;;  %1004 = vmatpush3.bf16.msra.mxu1 %v1174_v4  ;;  %v1171_v11 = vld [vmem:[%s1717_s4 + $0x30] sm:$0xff]   ;;  %v1172_v13 = vld [vmem:[%s1717_s4 + $0x38] sm:$0xff]  }
  0x81   : > { %967 = vmatprep.subr.bf16.mxu0 %v1175_v6  ;;  %997 = vmatprep.subr.bf16.mxu1 %v1175_v6 }
  0x83   : > { %314 = vxpose.xlu0.c.b16.cont [2/8] %v1166_v1, 128 }
  0x84   : > { %968 = vmatpush3.bf16.msra.mxu0 %v1175_v6  ;;  %1005 = vmatpush3.bf16.msra.mxu1 %v1175_v6 }
  0x85   : > { %969 = vmatprep.subr.bf16.mxu0 %v1176_v8  ;;  %998 = vmatprep.subr.bf16.mxu1 %v1176_v8 }
  0x87   : > { %315 = vxpose.xlu0.c.b16.cont [3/8] %v1167_v2, 128 }
  0x88   : > { %970 = vmatpush3.bf16.msra.mxu0 %v1176_v8  ;;  %1006 = vmatpush3.bf16.msra.mxu1 %v1176_v8 }
  0x89   : > { %971 = vmatprep.subr.bf16.mxu0 %v1177_v10  ;;  %999 = vmatprep.subr.bf16.mxu1 %v1177_v10 }
  0x8b   : > { %316 = vxpose.xlu0.c.b16.cont [4/8] %v1168_v5, 128 }
  0x8c   : > { %972 = vmatpush3.bf16.msra.mxu0 %v1177_v10  ;;  %1007 = vmatpush3.bf16.msra.mxu1 %v1177_v10 }
  0x8d   : > { %973 = vmatprep.subr.bf16.mxu0 %v1178_v12  ;;  %1000 = vmatprep.subr.bf16.mxu1 %v1178_v12 }
  0x8f   : > { %317 = vxpose.xlu0.c.b16.cont [5/8] %v1169_v7, 128 }
  0x90   : > { %974 = vmatpush3.bf16.msra.mxu0 %v1178_v12  ;;  %1008 = vmatpush3.bf16.msra.mxu1 %v1178_v12 }
  0x91   : > { %975 = vmatprep.subr.bf16.mxu0 %v1179_v14  ;;  %1001 = vmatprep.subr.bf16.mxu1 %v1179_v14 }
  0x93   : > { %318 = vxpose.xlu0.c.b16.cont [6/8] %v1170_v9, 128 }
  0x94   : > { %976 = vmatpush3.bf16.msra.mxu0 %v1179_v14  ;;  %1009 = vmatpush3.bf16.msra.mxu1 %v1179_v14 }
  0x95   : > { %977 = vmatprep.subr.bf16.mxu0 %v1180_v15  ;;  %1002 = vmatprep.subr.bf16.mxu1 %v1180_v15 }
  0x97   : > { %319 = vxpose.xlu0.c.b16.cont [7/8] %v1171_v11, 128 }
  0x98   : > { %978 = vmatpush3.bf16.msra.mxu0 %v1180_v15  ;;  %1010 = vmatpush3.bf16.msra.mxu1 %v1180_v15 }
  0x9b   : > { %320 = vxpose.xlu0.c.b16.end [8/8] %v1172_v13, 128 }
  0xe5   : > { %v321_v16 = vpop.trf.xlu0 }
  0xe6   : > { %979 = vmatprep.mubr.bf16.mxu0 %v321_v16 }
  0xe9   : > { %v322_v17 = vpop.trf.xlu0 }
  0xea   : > { %980 = vmatmul.mubr.bf16.vlgmr.msra.gmra.mrb[0].mxu0 %v322_v17 }
  0xed   : > { %v323_v18 = vpop.trf.xlu0 }
  0xee   : > { %983 = vmatprep.mubr.bf16.mxu0 %v323_v18 }
  0xf1   : > { %v324_v19 = vpop.trf.xlu0 }
  0xf2   : > { %984 = vmatmul.mubr.bf16.gmra.mrb[4].mxu0 %v324_v19 }
  0xf5   : > { %v325_v20 = vpop.trf.xlu0 }
  0xf6   : > { %987 = vmatprep.mubr.bf16.mxu1 %v325_v20 }
  0xf9   : > { %v326_v21 = vpop.trf.xlu0 }
  0xfa   : > { %988 = vmatmul.mubr.bf16.vlgmr.msra.gmra.mrb[0].mxu1 %v326_v21 }
  0xfd   : > { %v327_v22 = vpop.trf.xlu0 }
  0xfe   : > { %991 = vmatprep.mubr.bf16.mxu1 %v327_v22 }
 0x101   : > { %v328_v23 = vpop.trf.xlu0 }
 0x102   : > { %992 = vmatmul.mubr.bf16.gmra.mrb[4].mxu1 %v328_v23 }
 0x1bd   : > { %v981_v24 = vpop.f32.mrb[0].mxu0 }
 0x1be   : > { %v411_v25 = vpop.f32.mrb[1].mxu0  ;;  %480 = vst [vmem:[#allocation2 + $0x10] sm:$0xff] (!%p937_p6), %v981_v24 }
 0x1bf   : > { %v982_v26 = vpop.f32.mrb[2].mxu0  ;;  %478 = vst [vmem:[#allocation2] sm:$0xff] (!%p937_p6), %v411_v25 }
 0x1c0   : > { %v414_v27 = vpop.f32.mrb[3].mxu0  ;;  %481 = vst [vmem:[#allocation2 + $0x18] sm:$0xff] (!%p937_p6), %v982_v26 }
 0x1c1   : > { %479 = vst [vmem:[#allocation2 + $0x8] sm:$0xff] (!%p937_p6), %v414_v27 }
 0x1c5   : > { %v985_v28 = vpop.f32.mrb[4].mxu0 }
 0x1c6   : > { %v427_v29 = vpop.f32.mrb[5].mxu0  ;;  %484 = vst [vmem:[#allocation2 + $0x30] sm:$0xff] (!%p937_p6), %v985_v28 }
 0x1c7   : > { %v986_v30 = vpop.f32.mrb[6].mxu0  ;;  %482 = vst [vmem:[#allocation2 + $0x20] sm:$0xff] (!%p937_p6), %v427_v29 }
 0x1c8   : > { %v430_v31 = vpop.f32.mrb[7].mxu0  ;;  %485 = vst [vmem:[#allocation2 + $0x38] sm:$0xff] (!%p937_p6), %v986_v30 }
 0x1c9   : > { %483 = vst [vmem:[#allocation2 + $0x28] sm:$0xff] (!%p937_p6), %v430_v31 }
 0x1cd   : > { %v989_v32 = vpop.f32.mrb[0].mxu1 }
 0x1ce   : > { %v443_v33 = vpop.f32.mrb[1].mxu1  ;;  %488 = vst [vmem:[#allocation2 + $0x50] sm:$0xff] (!%p937_p6), %v989_v32 }
 0x1cf   : > { %v990_v34 = vpop.f32.mrb[2].mxu1  ;;  %486 = vst [vmem:[#allocation2 + $0x40] sm:$0xff] (!%p937_p6), %v443_v33 }
 0x1d0   : > { %v446_v35 = vpop.f32.mrb[3].mxu1  ;;  %489 = vst [vmem:[#allocation2 + $0x58] sm:$0xff] (!%p937_p6), %v990_v34 }
 0x1d1   : > { %487 = vst [vmem:[#allocation2 + $0x48] sm:$0xff] (!%p937_p6), %v446_v35 }
 0x1d2   : > { %477 = sbr.rel (%p937_p6) target bundleno = 474 (0x1da), region = 40 }
 0x1d5   : > { %v1735_v36 = vpop.f32.mrb[4].mxu1 }
 0x1d6   : > { %v459_v37 = vpop.f32.mrb[5].mxu1  ;;  %492 = vst [vmem:[#allocation2 + $0x70] sm:$0xff] (!%p937_p6), %v1735_v36 }
 0x1d7   : > { %v1737_v38 = vpop.f32.mrb[6].mxu1  ;;  %490 = vst [vmem:[#allocation2 + $0x60] sm:$0xff] (!%p937_p6), %v459_v37 }
 0x1d8   : > { %v462_v39 = vpop.f32.mrb[7].mxu1  ;;  %493 = vst [vmem:[#allocation2 + $0x78] sm:$0xff] (!%p937_p6), %v1737_v38 }
 0x1d9   : > { %491 = vst [vmem:[#allocation2 + $0x68] sm:$0xff] %v462_v39 }
 0x1da PF: > { %p938_p5 = scmp.le.s32.totalorder %s1383_s18, 0 }
 0x1db   : > { %v498_v40 = vld [vmem:[#allocation2] sm:$0xff] (!%p938_p5)  ;;  %v499_v41 = vld [vmem:[#allocation2 + $0x8] sm:$0xff] (!%p938_p5)  ;;  %v500_v42 = vld [vmem:[#allocation2 + $0x10] sm:$0xff] (!%p938_p5) }
 0x1dc   : > { %497 = sbr.rel (%p938_p5) target bundleno = 486 (0x1e6), region = 44  ;;  %v514_v43 = vadd.f32 (!%p938_p5), %v498_v40, %v411_v25  ;;  %v515_v44 = vadd.f32 (!%p938_p5), %v499_v41, %v414_v27  ;;  %v516_v45 = vadd.f32 (!%p938_p5), %v981_v24, %v500_v42  ;;  %v501_v46 = vld [vmem:[#allocation2 + $0x18] sm:$0xff] (!%p938_p5)  ;;  %v502_v47 = vld [vmem:[#allocation2 + $0x20] sm:$0xff] (!%p938_p5)  ;;  %v503_v48 = vld [vmem:[#allocation2 + $0x28] sm:$0xff] (!%p938_p5) }
 0x1dd   : > { %v517_v49 = vadd.f32 (!%p938_p5), %v982_v26, %v501_v46  ;;  %v518_v50 = vadd.f32 (!%p938_p5), %v502_v47, %v427_v29  ;;  %v519_v51 = vadd.f32 (!%p938_p5), %v503_v48, %v430_v31  ;;  %v504_v52 = vld [vmem:[#allocation2 + $0x30] sm:$0xff] (!%p938_p5)  ;;  %v505_v53 = vld [vmem:[#allocation2 + $0x38] sm:$0xff] (!%p938_p5)  ;;  %v506_v54 = vld [vmem:[#allocation2 + $0x40] sm:$0xff] (!%p938_p5) }
 0x1de   : > { %530 = vst [vmem:[#allocation2] sm:$0xff] (!%p938_p5), %v514_v43  ;;  %531 = vst [vmem:[#allocation2 + $0x8] sm:$0xff] (!%p938_p5), %v515_v44  ;;  %v520_v55 = vadd.f32 (!%p938_p5), %v985_v28, %v504_v52  ;;  %v521_v56 = vadd.f32 (!%p938_p5), %v986_v30, %v505_v53  ;;  %v522_v57 = vadd.f32 (!%p938_p5), %v506_v54, %v443_v33  ;;  %v507_v58 = vld [vmem:[#allocation2 + $0x48] sm:$0xff] (!%p938_p5)  ;;  %v508_v59 = vld [vmem:[#allocation2 + $0x50] sm:$0xff] (!%p938_p5) }
 0x1df   : > { %532 = vst [vmem:[#allocation2 + $0x10] sm:$0xff] (!%p938_p5), %v516_v45  ;;  %v509_v60 = vld [vmem:[#allocation2 + $0x58] sm:$0xff] (!%p938_p5)  ;;  %533 = vst [vmem:[#allocation2 + $0x18] sm:$0xff] (!%p938_p5), %v517_v49  ;;  %v523_v61 = vadd.f32 (!%p938_p5), %v507_v58, %v446_v35  ;;  %v524_v62 = vadd.f32 (!%p938_p5), %v989_v32, %v508_v59  ;;  %v510_v0 = vld [vmem:[#allocation2 + $0x60] sm:$0xff] (!%p938_p5) }
 0x1e0   : > { %534 = vst [vmem:[#allocation2 + $0x20] sm:$0xff] (!%p938_p5), %v518_v50  ;;  %535 = vst [vmem:[#allocation2 + $0x28] sm:$0xff] (!%p938_p5), %v519_v51  ;;  %v525_v63 = vadd.f32 (!%p938_p5), %v990_v34, %v509_v60  ;;  %v511_v1 = vld [vmem:[#allocation2 + $0x68] sm:$0xff] (!%p938_p5)  ;;  %v512_v2 = vld [vmem:[#allocation2 + $0x70] sm:$0xff] (!%p938_p5)  ;;  %v526_v3 = vadd.f32 (!%p938_p5), %v510_v0, %v459_v37 }
 0x1e1   : > { %536 = vst [vmem:[#allocation2 + $0x30] sm:$0xff] (!%p938_p5), %v520_v55  ;;  %537 = vst [vmem:[#allocation2 + $0x38] sm:$0xff] (!%p938_p5), %v521_v56  ;;  %v527_v4 = vadd.f32 (!%p938_p5), %v511_v1, %v462_v39  ;;  %v528_v5 = vadd.f32 (!%p938_p5), %v1735_v36, %v512_v2  ;;  %v513_v6 = vld [vmem:[#allocation2 + $0x78] sm:$0xff] (!%p938_p5) }
 0x1e2   : > { %538 = vst [vmem:[#allocation2 + $0x40] sm:$0xff] (!%p938_p5), %v522_v57  ;;  %539 = vst [vmem:[#allocation2 + $0x48] sm:$0xff] (!%p938_p5), %v523_v61  ;;  %v529_v7 = vadd.f32 (!%p938_p5), %v1737_v38, %v513_v6 }
 0x1e3   : > { %540 = vst [vmem:[#allocation2 + $0x50] sm:$0xff] %v524_v62  ;;  %541 = vst [vmem:[#allocation2 + $0x58] sm:$0xff] %v525_v63 }
 0x1e4   : > { %542 = vst [vmem:[#allocation2 + $0x60] sm:$0xff] %v526_v3  ;;  %543 = vst [vmem:[#allocation2 + $0x68] sm:$0xff] %v527_v4 }
 0x1e5   : > { %544 = vst [vmem:[#allocation2 + $0x70] sm:$0xff] %v528_v5  ;;  %545 = vst [vmem:[#allocation2 + $0x78] sm:$0xff] %v529_v7 }
 0x1e6 PF: > { %p939_p12 = scmp.ne.s32.totalorder %s1383_s18, 1 }
 0x1e7   : > { %s2070_s27 = sld [smem:[#allocation13_spill]] (!%p939_p12)  ;;  %s2071_s8 = sld [smem:[#allocation14_spill]] (!%p939_p12) }
 0x1e8   : > { %549 = sbr.rel (%p939_p12) target bundleno = 965 (0x3c5), region = 48  ;;  %v550_v8 = vld [vmem:[#allocation2] sm:$0xff] (!%p939_p12)  ;;  %v551_v9 = vld [vmem:[#allocation2 + $0x8] sm:$0xff] (!%p939_p12) }
 0x1e9   : > { %v552_v10 = vld [vmem:[#allocation2 + $0x10] sm:$0xff] (!%p939_p12)  ;;  %v1749_v11 = vmul.f32 (!%p939_p12), 0.00390625, %v550_v8  ;;  %v1751_v12 = vmul.f32 (!%p939_p12), 0.00390625, %v551_v9  ;;  %v553_v13 = vld [vmem:[#allocation2 + $0x18] sm:$0xff] (!%p939_p12) }
 0x1ea   : > { %v1753_v14 = vmul.f32 (!%p939_p12), 0.00390625, %v552_v10  ;;  %v554_v15 = vld [vmem:[#allocation2 + $0x20] sm:$0xff] (!%p939_p12)  ;;  %v1755_v16 = vmul.f32 (!%p939_p12), 0.00390625, %v553_v13  ;;  %v555_v19 = vld [vmem:[#allocation2 + $0x28] sm:$0xff] (!%p939_p12) }
 0x1eb   : > { %v1759_v17 = vmul.f32 (!%p939_p12), %v1749_v11, %v1749_v11  ;;  %v1763_v18 = vmul.f32 (!%p939_p12), %v1751_v12, %v1751_v12  ;;  %v1765_v20 = vmul.f32 (!%p939_p12), 0.00390625, %v554_v15  ;;  %v556_v22 = vld [vmem:[#allocation2 + $0x30] sm:$0xff] (!%p939_p12)  ;;  %v1771_v23 = vmul.f32 (!%p939_p12), 0.00390625, %v555_v19  ;;  %v557_v26 = vld [vmem:[#allocation2 + $0x38] sm:$0xff] (!%p939_p12)  ;;  %v562_v46 = vld [vmem:[#allocation2 + $0x60] sm:$0xff] (!%p939_p12) }
 0x1ec   : > { %v1769_v21 = vmul.f32 (!%p939_p12), %v1753_v14, %v1753_v14  ;;  %v1775_v24 = vmul.f32 (!%p939_p12), %v1755_v16, %v1755_v16  ;;  %v1779_v27 = vmul.f32 (!%p939_p12), 0.00390625, %v556_v22  ;;  %v558_v30 = vld [vmem:[#allocation2 + $0x40] sm:$0xff] (!%p939_p12)  ;;  %v1786_v31 = vmul.f32 (!%p939_p12), 0.00390625, %v557_v26  ;;  %v559_v34 = vld [vmem:[#allocation2 + $0x48] sm:$0xff] (!%p939_p12)  ;;  %v564_v54 = vld [vmem:[#allocation2 + $0x70] sm:$0xff] (!%p939_p12) }
 0x1ed   : > { %v598_v25 = vadd.f32 (!%p939_p12), %v1763_v18, %v1759_v17  ;;  %v1783_v28 = vmul.f32 (!%p939_p12), %v1765_v20, %v1765_v20  ;;  %v1790_v32 = vmul.f32 (!%p939_p12), %v1771_v23, %v1771_v23  ;;  %v1793_v35 = vmul.f32 (!%p939_p12), 0.00390625, %v558_v30  ;;  %v560_v38 = vld [vmem:[#allocation2 + $0x50] sm:$0xff] (!%p939_p12)  ;;  %v561_v42 = vld [vmem:[#allocation2 + $0x58] sm:$0xff] (!%p939_p12)  ;;  %v563_v50 = vld [vmem:[#allocation2 + $0x68] sm:$0xff] (!%p939_p12)  ;;  %p940_p7 = scmp.ne.s32.totalorder (!%p939_p12), %s2071_s8, %s2070_s27 }
 0x1ee   : > { %v1797_v36 = vmul.f32 (!%p939_p12), %v1779_v27, %v1779_v27  ;;  %v1800_v39 = vmul.f32 (!%p939_p12), 0.00390625, %v559_v34  ;;  %v1804_v40 = vmul.f32 (!%p939_p12), %v1786_v31, %v1786_v31  ;;  %v1807_v43 = vmul.f32 (!%p939_p12), 0.00390625, %v560_v38  ;;  %v565_v58 = vld [vmem:[#allocation2 + $0x78] sm:$0xff] (!%p939_p12) }
 0x1ef   : > { %v599_v29 = vadd.f32 %v598_v25, %v1769_v21  ;;  %v1811_v44 = vmul.f32 %v1793_v35, %v1793_v35  ;;  %v1814_v47 = vmul.f32 0.00390625, %v561_v42  ;;  %v1821_v51 = vmul.f32 0.00390625, %v562_v46 }
 0x1f0   : > { %v1818_v48 = vmul.f32 %v1800_v39, %v1800_v39  ;;  %v1825_v52 = vmul.f32 %v1807_v43, %v1807_v43  ;;  %v1828_v55 = vmul.f32 0.00390625, %v563_v50  ;;  %v1835_v59 = vmul.f32 0.00390625, %v564_v54 }
 0x1f1   : > { %v600_v33 = vadd.f32 %v599_v29, %v1775_v24  ;;  %v1832_v56 = vmul.f32 %v1814_v47, %v1814_v47  ;;  %v1839_v60 = vmul.f32 %v1821_v51, %v1821_v51  ;;  %v1842_v62 = vmul.f32 0.00390625, %v565_v58 }
 0x1f2   : > { %v1846_v63 = vmul.f32 %v1828_v55, %v1828_v55  ;;  %v1851_v1 = vmul.f32 %v1835_v59, %v1835_v59  ;;  %v630_v25 = vlaneseq (!%p940_p7)  ;;  %v665_v26 = vmul.f32 (!%p940_p7), 0.9949, %v1759_v17 }
 0x1f3   : > { %v601_v37 = vadd.f32 %v600_v33, %v1783_v28  ;;  %v1856_v3 = vmul.f32 %v1842_v62, %v1842_v62  ;;  %v666_v29 = vmul.f32 (!%p940_p7), 0.9949, %v1763_v18  ;;  %v681_v30 = vmul.f32 (!%p940_p7), 2.0, %v1749_v11 }
 0x1f4   : > { %v682_v33 = vmul.f32 (!%p940_p7), 2.0, %v1751_v12  ;;  %v1868_v34 = vshrl.u32 (!%p940_p7), %v630_v25, 7  ;;  %v683_v38 = vmul.f32 (!%p940_p7), 2.0, %v1753_v14  ;;  %v684_v42 = vmul.f32 (!%p940_p7), 2.0, %v1755_v16 }
 0x1f5   : > { %v602_v41 = vadd.f32 %v601_v37, %v1790_v32  ;;  %v667_v37 = vmul.f32 (!%p940_p7), 0.9949, %v1769_v21  ;;  %v669_v11 = vmul.f32 (!%p940_p7), 0.9949, %v1783_v28  ;;  %v685_v12 = vmul.f32 (!%p940_p7), 2.0, %v1765_v20 }
 0x1f6   : > { %v698_v46 = vsub.f32 (!%p940_p7), %v666_v29, %v682_v33  ;;  %v632_v17 = vadd.s32 (!%p940_p7), 8, %v1868_v34  ;;  %v633_v50 = vadd.s32 (!%p940_p7), 16, %v1868_v34  ;;  %v670_v21 = vmul.f32 (!%p940_p7), 0.9949, %v1790_v32 }
 0x1f7   : > { %v603_v45 = vadd.f32 %v602_v41, %v1797_v36  ;;  %v668_v41 = vmul.f32 (!%p940_p7), 0.9949, %v1775_v24  ;;  %v699_v18 = vsub.f32 (!%p940_p7), %v667_v37, %v683_v38  ;;  %v686_v14 = vmul.f32 (!%p940_p7), 2.0, %v1771_v23 }
 0x1f8   : > { %v714_v16 = vadd.f32 (!%p940_p7), 1.0, %v698_v46  ;;  %v634_v54 = vadd.s32 (!%p940_p7), 24, %v1868_v34  ;;  %v671_v28 = vmul.f32 (!%p940_p7), 0.9949, %v1797_v36  ;;  %v687_v20 = vmul.f32 (!%p940_p7), 2.0, %v1779_v27 }
 0x1f9   : > { %v604_v49 = vadd.f32 %v603_v45, %v1804_v40  ;;  %v697_v45 = vsub.f32 (!%p940_p7), %v665_v26, %v681_v30  ;;  %v700_v24 = vsub.f32 (!%p940_p7), %v668_v41, %v684_v42  ;;  %v715_v58 = vadd.f32 (!%p940_p7), 1.0, %v699_v18 }
 0x1fa   : > { %v635_v32 = vadd.s32 (!%p940_p7), 32, %v1868_v34  ;;  %v672_v23 = vmul.f32 (!%p940_p7), 0.9949, %v1804_v40  ;;  %v673_v27 = vmul.f32 (!%p940_p7), 0.9949, %v1811_v44  ;;  %v689_v36 = vmul.f32 (!%p940_p7), 2.0, %v1793_v35 }
 0x1fb   : > { %v605_v53 = vadd.f32 %v604_v49, %v1811_v44  ;;  %v1875_v49 = vand.u32 (!%p940_p7), 127, %v630_v25  ;;  %v638_v25 = vadd.s32 (!%p940_p7), 56, %v1868_v34  ;;  %v675_v35 = vmul.f32 (!%p940_p7), 0.9949, %v1825_v52 }
 0x1fc   : > { %v691_v26 = vmul.f32 (!%p940_p7), 2.0, %v1807_v43  ;;  %v705_v29 = vsub.f32 (!%p940_p7), %v673_v27, %v689_v36  ;;  %v692_v38 = vmul.f32 (!%p940_p7), 2.0, %v1814_v47  ;;  %v677_v43 = vmul.f32 (!%p940_p7), 0.9949, %v1839_v60 }
 0x1fd   : > { %v606_v57 = vadd.f32 %v605_v53, %v1818_v48  ;;  %v713_v53 = vadd.f32 (!%p940_p7), 1.0, %v697_v45  ;;  %vm649_vm0 = vcmp.eq.s32.totalorder (!%p940_p7), %v1868_v34, %v1875_v49  ;;  %vm650_vm1 = vcmp.eq.s32.totalorder (!%p940_p7), %v632_v17, %v1875_v49 }
 0x1fe   : > { %vm651_vm2 = vcmp.eq.s32.totalorder (!%p940_p7), %v633_v50, %v1875_v49  ;;  %vm652_vm3 = vcmp.eq.s32.totalorder (!%p940_p7), %v634_v54, %v1875_v49  ;;  %vm653_vm4 = vcmp.eq.s32.totalorder (!%p940_p7), %v635_v32, %v1875_v49  ;;  %vm656_vm7 = vcmp.eq.s32.totalorder (!%p940_p7), %v638_v25, %v1875_v49 }
 0x1ff   : > { %v607_v61 = vadd.f32 %v606_v57, %v1825_v52  ;;  %v701_v57 = vsub.f32 (!%p940_p7), %v669_v11, %v685_v12  ;;  %v640_v52 = vadd.s32 (!%p940_p7), 72, %v1868_v34  ;;  %v693_v17 = vmul.f32 (!%p940_p7), 2.0, %v1821_v51 }
 0x200   : > { %v707_v11 = vsub.f32 (!%p940_p7), %v675_v35, %v691_v26  ;;  %v721_v12 = vadd.f32 (!%p940_p7), 1.0, %v705_v29  ;;  %v678_v47 = vmul.f32 (!%p940_p7), 0.9949, %v1846_v63  ;;  %v679_v51 = vmul.f32 (!%p940_p7), 0.9949, %v1851_v1 }
 0x201   : > { %v608_v0 = vadd.f32 %v607_v61, %v1832_v56  ;;  %v688_v61 = vmul.f32 (!%p940_p7), 2.0, %v1786_v31  ;;  %v674_v31 = vmul.f32 (!%p940_p7), 0.9949, %v1818_v48  ;;  %v639_v48 = vadd.s32 (!%p940_p7), 64, %v1868_v34 }
 0x202   : > { %vm658_vm9 = vcmp.eq.s32.totalorder (!%p940_p7), %v640_v52, %v1875_v49  ;;  %v695_v54 = vmul.f32 (!%p940_p7), 2.0, %v1835_v59  ;;  %v696_v32 = vmul.f32 (!%p940_p7), 2.0, %v1842_v62  ;;  %v646_v62 = vadd.s32 (!%p940_p7), 120, %v1868_v34 }
 0x203   : > { %v609_v2 = vadd.f32 %v608_v0, %v1839_v60  ;;  %v702_v0 = vsub.f32 (!%p940_p7), %v670_v21, %v686_v14  ;;  %vm657_vm8 = vcmp.eq.s32.totalorder (!%p940_p7), %v639_v48, %v1875_v49  ;;  %v694_v21 = vmul.f32 (!%p940_p7), 2.0, %v1828_v55 }
 0x204   : > { %v642_v60 = vadd.s32 (!%p940_p7), 88, %v1868_v34  ;;  %v680_v55 = vmul.f32 (!%p940_p7), 0.9949, %v1856_v3  ;;  %vm664_vm15 = vcmp.eq.s32.totalorder (!%p940_p7), %v646_v62, %v1875_v49 }
 0x205   : > { %v610_v4 = vadd.f32 %v609_v2, %v1846_v63  ;;  %v716_v2 = vadd.f32 (!%p940_p7), 1.0, %v700_v24  ;;  %v643_v63 = vadd.s32 (!%p940_p7), 96, %v1868_v34 }
 0x206   : > { %vm660_vm11 = vcmp.eq.s32.totalorder (!%p940_p7), %v642_v60, %v1875_v49 }
 0x207   : > { %v611_v5 = vadd.f32 %v610_v4, %v1851_v1  ;;  %v729_v4 = vsel (!%p940_p7), %vm649_vm0, %v713_v53, 0.0  ;;  %v644_v1 = vadd.s32 (!%p940_p7), 104, %v1868_v34  ;;  %vm661_vm12 = vcmp.eq.s32.totalorder (!%p940_p7), %v643_v63, %v1875_v49 }
 0x209   : > { %v612_v6 = vadd.f32 %v611_v5, %v1856_v3  ;;  %v730_v5 = vsel (!%p940_p7), %vm650_vm1, %v714_v16, 0.0  ;;  %v712_v3 = vsub.f32 (!%p940_p7), %v680_v55, %v696_v32  ;;  %vm662_vm13 = vcmp.eq.s32.totalorder (!%p940_p7), %v644_v1, %v1875_v49 }
 0x20a   : > { %v746_v40 = vadd.f32 (!%p940_p7), %v730_v5, %v729_v4 }
 0x20b   : > { %613 = vadd.xlane.f32.xlu0 %v612_v6  ;;  %v636_v6 = vadd.s32 (!%p940_p7), 40, %v1868_v34 }
 0x20d   : > { %vm654_vm5 = vcmp.eq.s32.totalorder (!%p940_p7), %v636_v6, %v1875_v49  ;;  %v645_v6 = vadd.s32 (!%p940_p7), 112, %v1868_v34 }
 0x20f   : > { %vm663_vm14 = vcmp.eq.s32.totalorder (!%p940_p7), %v645_v6, %v1875_v49 }
 0x298   : > { %v614_v7 = vpop.xlane.xlu0 %613 }
 0x299   : > { %v615_v8 = vrot.slane %v614_v7, 4 }
 0x29b   : > { %v616_v9 = vadd.f32 %v615_v8, %v614_v7  ;;  %v703_v7 = vsub.f32 (!%p940_p7), %v671_v28, %v687_v20  ;;  %v717_v8 = vadd.f32 (!%p940_p7), 1.0, %v701_v57  ;;  %v709_v28 = vsub.f32 (!%p940_p7), %v677_v43, %v693_v17 }
 0x29c   : > { %v723_v20 = vadd.f32 (!%p940_p7), 1.0, %v707_v11  ;;  %v737_v57 = vsel (!%p940_p7), %vm657_vm8, %v721_v12, 0.0 }
 0x29d   : > { %v617_v10 = vrot.slane %v616_v9, 2  ;;  %v719_v30 = vadd.f32 (!%p940_p7), 1.0, %v703_v7  ;;  %v733_v33 = vsel (!%p940_p7), %vm653_vm4, %v717_v8, 0.0  ;;  %v725_v4 = vadd.f32 (!%p940_p7), 1.0, %v709_v28 }
 0x29f   : > { %v618_v13 = vadd.f32 %v617_v10, %v616_v9  ;;  %v731_v9 = vsel (!%p940_p7), %vm651_vm2, %v715_v58, 0.0  ;;  %v637_v10 = vadd.s32 (!%p940_p7), 48, %v1868_v34 }
 0x2a0   : > { %v747_v44 = vadd.f32 (!%p940_p7), %v746_v40, %v731_v9  ;;  %v728_v40 = vadd.f32 (!%p940_p7), 1.0, %v712_v3 }
 0x2a1   : > { %v619_v15 = vrot.slane %v618_v13, 1  ;;  %vm655_vm6 = vcmp.eq.s32.totalorder (!%p940_p7), %v637_v10, %v1875_v49  ;;  %v741_v10 = vsel (!%p940_p7), %vm661_vm12, %v725_v4, 0.0 }
 0x2a2   : > { %v735_v18 = vsel (!%p940_p7), %vm655_vm6, %v719_v30, 0.0  ;;  %v744_v25 = vsel (!%p940_p7), %vm664_vm15, %v728_v40, 0.0 }
 0x2a3   : > { %v620_v19 = vadd.f32 %v619_v15, %v618_v13  ;;  %v690_v13 = vmul.f32 (!%p940_p7), 2.0, %v1800_v39  ;;  %v704_v15 = vsub.f32 (!%p940_p7), %v672_v23, %v688_v61  ;;  %v676_v39 = vmul.f32 (!%p940_p7), 0.9949, %v1832_v56 }
 0x2a4   : > { %v641_v56 = vadd.s32 (!%p940_p7), 80, %v1868_v34  ;;  %v710_v23 = vsub.f32 (!%p940_p7), %v678_v47, %v694_v21 }
 0x2a5   : > { %1011 = vpush %v620_v19  ;;  %v718_v19 = vadd.f32 (!%p940_p7), 1.0, %v702_v0  ;;  %v706_v41 = vsub.f32 (!%p940_p7), %v674_v31, %v690_v13  ;;  %v720_v42 = vadd.f32 (!%p940_p7), 1.0, %v704_v15  ;;  %v708_v14 = vsub.f32 (!%p940_p7), %v676_v39, %v692_v38 }
 0x2a6   : > { %vm659_vm10 = vcmp.eq.s32.totalorder (!%p940_p7), %v641_v56, %v1875_v49  ;;  %v726_v36 = vadd.f32 (!%p940_p7), 1.0, %v710_v23 }
 0x2a7   : > { %v734_v45 = vsel (!%p940_p7), %vm654_vm5, %v718_v19, 0.0  ;;  %v722_v24 = vadd.f32 (!%p940_p7), 1.0, %v706_v41  ;;  %v736_v53 = vsel (!%p940_p7), %vm656_vm7, %v720_v42, 0.0  ;;  %v724_v61 = vadd.f32 (!%p940_p7), 1.0, %v708_v14 }
 0x2a8   : > { %v739_v5 = vsel (!%p940_p7), %vm659_vm10, %v723_v20, 0.0  ;;  %v742_v13 = vsel (!%p940_p7), %vm662_vm13, %v726_v36, 0.0 }
 0x2a9   : > { %v738_v0 = vsel (!%p940_p7), %vm658_vm9, %v722_v24, 0.0  ;;  %v740_v7 = vsel (!%p940_p7), %vm660_vm11, %v724_v61, 0.0 }
 0x2d4   : > { %629 = sbr.rel (%p940_p7) target bundleno = 965 (0x3c5), region = 52 }
 0x2d6   : > { %s1012_s18 = spop %1011 }
 0x2d7   : > { %s622_s19 = smul.f32 0.0051, %s1012_s18 }
 0x2d9   : > { %v623_v22 = vstv %s622_s19 }
 0x2da   : > { %625 = vst [vmem:[%s1740_s15] sm:$0xff] %v623_v22  ;;  %v732_v22 = vsel (!%p940_p7), %vm652_vm3, %v716_v2, 0.0  ;;  %v711_v2 = vsub.f32 (!%p940_p7), %v679_v51, %v695_v54 }
 0x2db   : > { %v748_v37 = vadd.f32 %v747_v44, %v732_v22 }
 0x2dc   : > { %v727_v9 = vadd.f32 1.0, %v711_v2 }
 0x2dd   : > { %v749_v46 = vadd.f32 %v748_v37, %v733_v33 }
 0x2de   : > { %v743_v19 = vsel %vm663_vm14, %v727_v9, 0.0 }
 0x2df   : > { %v750_v50 = vadd.f32 %v749_v46, %v734_v45 }
 0x2e1   : > { %v751_v16 = vadd.f32 %v750_v50, %v735_v18  ;;  %v745_v37 = vld [vmem:[%s1740_s15] sm:$0xff] }
 0x2e3   : > { %v752_v58 = vadd.f32 %v751_v16, %v736_v53 }
 0x2e5   : > { %v753_v59 = vadd.f32 %v752_v58, %v737_v57 }
 0x2e7   : > { %v754_v27 = vadd.f32 %v753_v59, %v738_v0 }
 0x2e9   : > { %v755_v8 = vadd.f32 %v754_v27, %v739_v5 }
 0x2eb   : > { %v756_v31 = vadd.f32 %v755_v8, %v740_v7 }
 0x2ed   : > { %v757_v15 = vadd.f32 %v756_v31, %v741_v10 }
 0x2ef   : > { %v758_v22 = vadd.f32 %v757_v15, %v742_v13 }
 0x2f1   : > { %v759_v35 = vadd.f32 %v758_v22, %v743_v19 }
 0x2f3   : > { %v760_v34 = vadd.f32 %v759_v35, %v744_v25 }
 0x2f5   : > { %761 = vadd.xlane.f32.xlu0 %v760_v34 }
 0x382   : > { %v762_v44 = vpop.xlane.xlu0 %761 }
 0x383   : > { %v763_v26 = vrot.slane %v762_v44, 4 }
 0x385   : > { %v764_v29 = vadd.f32 %v763_v26, %v762_v44 }
 0x387   : > { %v765_v30 = vrot.slane %v764_v29, 2 }
 0x389   : > { %v766_v33 = vadd.f32 %v765_v30, %v764_v29 }
 0x38b   : > { %v767_v48 = vrot.slane %v766_v33, 1 }
 0x38d   : > { %v768_v39 = vadd.f32 %v767_v48, %v766_v33 }
 0x38f   : > { %1013 = vpush %v768_v39 }
 0x3c0   : > { %s1014_s28 = spop %1013 }
 0x3c1   : > { %v770_v49 = vstv %s1014_s28 }
 0x3c2   : > { %v771_v38 = vadd.f32 %v770_v49, %v745_v37 }
 0x3c4   : > { %772 = vst [vmem:[%s1740_s15] sm:$0xff] %v771_v38 }
 0x3c5 PF: > { %s2072_s0 = sld [smem:[#allocation14_spill]]  ;;  %s2073_s20 = sld [smem:[#allocation13_spill]] }
 0x3c6   : > { %s2074_s25 = sld [smem:[#allocation18_spill]]  ;;  %s789_s9 = sshll.u32 %s1740_s15, 4  ;;  %s1937_s9 = int_to_ptr.vmem [resolvable:$true] %s789_s9 }
 0x3c7   : > { %s2075_s5 = sld [smem:[#allocation22_spill]]  ;;  %s774_s18 = scalar_lea.sflag [#allocation5], %s223_s3 }
 0x3c8   : > { %s1241_s19 = scalar_lea.vmem %s1937_s9, 128  ;;  %s1414_s27 = smov [#allocation8]  }
 0x3c9   : > { %p1242_p3 = scmp.ne.s32.totalorder %s1937_s9, %s1241_s19  ;;  %s1245_s8 = sshll.u32 %s1414_s27, 4  ;;  %s1246_s8 = int_to_ptr.vmem [resolvable:$false] %s1245_s8 }
 0x3ca   : > { %s1247_s15 = scalar_lea.vmem %s1246_s8, 256  ;;  %p1248_p1 = scmp.lt.s32.totalorder %s1937_s9, %s1246_s8 }
 0x3cb   : > { %s942_s2 = sshll.u32 %s2072_s0, 1  ;;  %p1249_p13 = scmp.lt.s32.totalorder %s1247_s15, %s1241_s19 }
 0x3cc   : > { %s785_s7 = sadd.s32 %s2073_s20, %s942_s2  ;;  %p2076_p8 = scmp.ne.s32.totalorder %s2074_s25, 0 }
 0x3cd   : > { %s943_s30 = sshll.u32 %s785_s7, 7  ;;  %p1250_p9 = por %p1249_p13, %p1248_p1 }
 0x3ce   : > { %s787_s4 = scalar_lea.hbm %s2075_s5, %s943_s30  ;;  %p1243_p10 = pnand %p1242_p3, %p2076_p8 }
 0x3d0   : > { %p1244_p2 = pneg %p1243_p10 }
 0x3d2   : > { %p1251_p11 = pnand %p1250_p9, %p1244_p2 }
 0x3d4   : > { %1254 = shalt.err (!%p1251_p11)
}
 0x3d5   : > { %s1255_s28 = scalar_lea.hbm %s787_s4, 128  ;;  %s1259_s20 = scalar_lea.hbm %s2075_s5, 512 }
 0x3d6   : > { %p1256_p0 = scmp.ne.s32.totalorder %s787_s4, %s1255_s28  ;;  %p1260_p5 = scmp.lt.u32.totalorder %s787_s4, %s2075_s5 }
 0x3d7   : > { %p1261_p12 = scmp.lt.u32.totalorder %s1259_s20, %s1255_s28  ;;  %p1263_p3 = scmp.lt.u32.totalorder %s1255_s28, %s787_s4 }
 0x3d8   : > { %p1257_p4 = pnand %p1256_p0, %p2076_p8 }
 0x3d9   : > { %p1262_p7 = por %p1261_p12, %p1260_p5 }
 0x3da   : > { %p1258_p6 = pneg %p1257_p4 }
 0x3db   : > { %p1264_p10 = por %p1263_p3, %p1262_p7 }
 0x3dd   : > { %p1265_p2 = pnand %p1264_p10, %p1258_p6 }
 0x3df   : > { %1268 = shalt.err (!%p1265_p2)
}
 0x3e0   : > { %1019 = dma.vmem_to_hbm [thread:$0]  (%p2076_p8), %s1937_s9, 128, %s787_s4, %s774_s18  }
 0x3e1 PF: > { %s2077_s30 = sld [smem:[#allocation12_spill]]  ;;  %p1033_p1 = scmp.ge.s32.totalorder %s1407_s24, 2 }
 0x3e2   : > { %p2078_p13 = scmp.ne.s32.totalorder %s2062_s12, 0 }
 0x3e4   : > { %p1029_p9 = pnand %p1033_p1, %p2078_p13 }
 0x3e7   : > { %s801_s6 = sand.u32 1, %s2077_s30  }
 0x3e8   : > { %s802_s23 = scalar_lea.sflag [#allocation5], %s801_s6 }
 0x3e9   : > { %1342 = dma.done.wait (!%p1029_p9), %s802_s23, 128  }
 0x3ea   : > { %1344 = vsyncadd (!%p1029_p9), %s802_s23, 4294967168  ;;  %s21_s24 = sadd.s32 1, %s1407_s24   ;;  %s2080_s25 = sld [smem:[#allocation20_spill]] }
 0x3eb   : > { %p1965_p11 = scmp.ge.s32.totalorder %s21_s24, 10   ;;  %s2081_s20 = sld [smem:[#allocation15_spill]] }
 0x3ec   : > { %s2082_s4 = sld [smem:[#allocation16_spill]]  ;;  %s2083_s27 = sld [smem:[#allocation17_spill]] }
 0x3ed   : > { %s2084_s23 = sld [smem:[#allocation19_spill]]  ;;  %s2085_s9 = smov %s1351_s10 }
 0x3ee   : > { %s2087_s10 = smov %s1355_s11  ;;  %s2088_s11 = smov %s1642_s26 }
 0x3ef   : > { %s2089_s12 = smov %s1363_s13  ;;  %s2090_s13 = smov %s1367_s14 }
 0x3f0   : > { %s2091_s14 = smov %s2080_s25  ;;  %s2092_s15 = smov %s1375_s16 }
 0x3f1   : > { %s2093_s16 = smov %s1379_s17  ;;  %s2094_s17 = smov %s1639_s29 }
 0x3f2   : > { %s2095_s18 = smov %s1395_s21  ;;  %s2096_s19 = smov %s1399_s22 }
 0x3f3   : > { %s2097_s21 = smov %s2082_s4  ;;  %s2098_s22 = smov %s2083_s27 }
 0x3f4   :  { %20 = sbr.rel (!%p1965_p11) target bundleno = 16 (0x10), region = 103 }
 0x3fb   :  { %807 = vsyncpa [#allocation4], 1 }
 0x3fc   :  { %809 = vsyncpa [#allocation4 + $0x1], 1 }
 0x3fd   :  { %810 = vsyncpa [#allocation7], 1 }
 0x3fe   :  { %812 = vsyncpa [#allocation7 + $0x1], 1 }
 0x3ff   :  { %813 = vsyncpa [#allocation5], 1 }
 0x400   :  { %815 = vsyncpa [#allocation5 + $0x1], 1 }

</bundles_post_ra>
